<compile_context>
chip_gen: v6e
topology: v6e:2x2x1
jax: 0.10.0
libtpu: 0.0.40
codegen_flags: <defaults>
</compile_context>

<pallas_src>
import jax
import jax.numpy as jnp
from jax.experimental import pallas as pl
from jax.experimental.pallas import tpu as pltpu


def _round_up(x, m):
    return (x + m - 1) // m * m


def actor_net_kernel(x_ref, w1_ref, b1_ref, w2_ref, b2_ref, o_ref):
    # x: [TB, S]  w1: [S, H]  b1: [1, H]  w2: [H, A]  b2: [1, A]  o: [TB, A]
    x = x_ref[...]
    h = jnp.dot(x, w1_ref[...], preferred_element_type=jnp.float32)       # MXU
    h = jnp.maximum(h + b1_ref[...], 0.0)                                 # VPU bias + ReLU
    logits = jnp.dot(h, w2_ref[...], preferred_element_type=jnp.float32)  # MXU
    logits = logits + b2_ref[...]
    # numerically-stable softmax over the (narrow) action dim
    m = jnp.max(logits, axis=-1, keepdims=True)                           # XLU reduce
    e = jnp.exp(logits - m)                                               # EUP
    denom = jnp.sum(e, axis=-1, keepdims=True)                            # XLU reduce
    inv = pl.reciprocal(denom, approx=False)                              # exact -> rows sum to 1
    o_ref[...] = (e * inv).astype(o_ref.dtype)


def actor_net_forward(x, w1, b1, w2, b2, *, block_b=1024):
    """x: [B, num_state]; w1: [num_state,128]; b1: [1,128];
       w2: [128,num_action]; b2: [1,num_action]  ->  probs [B, num_action]."""
    B, S = x.shape
    H = w1.shape[1]
    A = w2.shape[1]

    # Batch tile: at most block_b rows, rounded to the sublane multiple (8).
    # Ragged last block (B % TB != 0) is handled by Pallas masked stores.
    TB = min(block_b, _round_up(B, 8))
    grid = (pl.cdiv(B, TB),)

    out = pl.pallas_call(
        actor_net_kernel,
        out_shape=jax.ShapeDtypeStruct((B, A), jnp.float32),
        grid=grid,
        in_specs=[
            pl.BlockSpec((TB, S), lambda i: (i, 0)),   # batch-tiled input
            pl.BlockSpec((S, H), lambda i: (0, 0)),    # weights: constant block -> VMEM-resident
            pl.BlockSpec((1, H), lambda i: (0, 0)),
            pl.BlockSpec((H, A), lambda i: (0, 0)),
            pl.BlockSpec((1, A), lambda i: (0, 0)),
        ],
        out_specs=pl.BlockSpec((TB, A), lambda i: (i, 0)),  # full-width row -> contiguous writeback
        compiler_params=pltpu.CompilerParams(
            dimension_semantics=("parallel",)),        # megacore / v7x 2-TC sharding
    )(x, w1, b1, w2, b2)

    return out


if __name__ == "__main__":
    # Small shapes consistent with the module: num_state=32, num_action=6, batch=8.
    B, NUM_STATE, HIDDEN, NUM_ACTION = 8, 32, 128, 6

    key = jax.random.PRNGKey(0)
    k_x, k_w1, k_b1, k_w2, k_b2 = jax.random.split(key, 5)

    # Deterministic synthetic parameters (generated directly in (in,out) layout).
    x = jax.random.normal(k_x, (B, NUM_STATE), dtype=jnp.float32)
    w1 = jax.random.normal(k_w1, (NUM_STATE, HIDDEN), dtype=jnp.float32) * 0.1
    b1 = jax.random.normal(k_b1, (1, HIDDEN), dtype=jnp.float32) * 0.1
    w2 = jax.random.normal(k_w2, (HIDDEN, NUM_ACTION), dtype=jnp.float32) * 0.1
    b2 = jax.random.normal(k_b2, (1, NUM_ACTION), dtype=jnp.float32) * 0.1

    probs = actor_net_forward(x, w1, b1, w2, b2)
    probs = jax.block_until_ready(probs)

    # Pure-JAX reference of the same forward pass.
    h_ref = jnp.maximum(x @ w1 + b1, 0.0)
    ref = jax.nn.softmax(h_ref @ w2 + b2, axis=-1)

    assert probs.shape == (B, NUM_ACTION)
    # Exact normalization -> tight tolerances.
    assert jnp.allclose(probs, ref, atol=1e-4, rtol=1e-4)
    assert jnp.allclose(jnp.sum(probs, axis=-1), 1.0, atol=1e-5)

    print("KERNEL_OK")
</pallas_src>

<mosaic_0001>
module attributes {stable_mosaic.version = 11 : i64} {
  func.func @actor_net_kernel(%arg0: i32, %arg1: memref<8x32xf32, #tpu.memory_space<vmem>>, %arg2: memref<32x128xf32, #tpu.memory_space<vmem>>, %arg3: memref<1x128xf32, #tpu.memory_space<vmem>>, %arg4: memref<128x6xf32, #tpu.memory_space<vmem>>, %arg5: memref<1x6xf32, #tpu.memory_space<vmem>>, %arg6: memref<8x6xf32, #tpu.memory_space<vmem>>) attributes {dimension_semantics = [#tpu.dimension_semantics<parallel>], iteration_bounds = array<i64: 1>, scalar_prefetch = 0 : i64, scratch_operands = 0 : i64, tpu.core_type = #tpu.core_type<tc>, window_params = [{transform_indices = @transform_0, window_bounds = array<i64: 8, 32>}, {pipeline_mode = #tpu.pipeline_mode<synchronous>, transform_indices = @transform_1, window_bounds = array<i64: 32, 128>}, {pipeline_mode = #tpu.pipeline_mode<synchronous>, transform_indices = @transform_2, window_bounds = array<i64: 1, 128>}, {pipeline_mode = #tpu.pipeline_mode<synchronous>, transform_indices = @transform_3, window_bounds = array<i64: 128, 6>}, {pipeline_mode = #tpu.pipeline_mode<synchronous>, transform_indices = @transform_4, window_bounds = array<i64: 1, 6>}, {transform_indices = @transform_5, window_bounds = array<i64: 8, 6>}]} {
    %c0 = arith.constant 0 : index
    %c0_0 = arith.constant 0 : index
    %0 = vector.load %arg1[%c0, %c0_0] : memref<8x32xf32, #tpu.memory_space<vmem>>, vector<8x32xf32>
    %c0_1 = arith.constant 0 : index
    %c0_2 = arith.constant 0 : index
    %1 = vector.load %arg2[%c0_1, %c0_2] : memref<32x128xf32, #tpu.memory_space<vmem>>, vector<32x128xf32>
    %cst = arith.constant dense<0.000000e+00> : vector<8x128xf32>
    %2 = tpu.matmul %0, %1, %cst {dimension_numbers = #tpu.dot_dimension_numbers<[1], [0], [0], [1], [0, 0, 1, 1], [], []>} : vector<8x32xf32>, vector<32x128xf32>, vector<8x128xf32> -> vector<8x128xf32>
    %c0_3 = arith.constant 0 : index
    %c0_4 = arith.constant 0 : index
    %3 = vector.load %arg3[%c0_3, %c0_4] : memref<1x128xf32, #tpu.memory_space<vmem>>, vector<1x128xf32>
    %4 = vector.broadcast %3 : vector<1x128xf32> to vector<8x128xf32>
    %5 = arith.addf %2, %4 : vector<8x128xf32>
    %cst_5 = arith.constant 0.000000e+00 : f32
    %6 = vector.broadcast %cst_5 : f32 to vector<8x128xf32>
    %7 = arith.maximumf %5, %6 : vector<8x128xf32>
    %c0_6 = arith.constant 0 : index
    %c0_7 = arith.constant 0 : index
    %8 = vector.load %arg4[%c0_6, %c0_7] : memref<128x6xf32, #tpu.memory_space<vmem>>, vector<128x6xf32>
    %cst_8 = arith.constant dense<0.000000e+00> : vector<8x6xf32>
    %9 = tpu.matmul %7, %8, %cst_8 {dimension_numbers = #tpu.dot_dimension_numbers<[1], [0], [0], [1], [0, 0, 1, 1], [], []>} : vector<8x128xf32>, vector<128x6xf32>, vector<8x6xf32> -> vector<8x6xf32>
    %c0_9 = arith.constant 0 : index
    %c0_10 = arith.constant 0 : index
    %10 = vector.load %arg5[%c0_9, %c0_10] : memref<1x6xf32, #tpu.memory_space<vmem>>, vector<1x6xf32>
    %11 = vector.broadcast %10 : vector<1x6xf32> to vector<8x6xf32>
    %12 = arith.addf %9, %11 : vector<8x6xf32>
    %cst_11 = arith.constant dense<0xFF800000> : vector<8xf32>
    %13 = vector.multi_reduction <maximumf>, %12, %cst_11 [1] : vector<8x6xf32> to vector<8xf32>
    %14 = vector.shape_cast %13 : vector<8xf32> to vector<8x1xf32>
    %15 = vector.broadcast %14 : vector<8x1xf32> to vector<8x6xf32>
    %16 = arith.subf %12, %15 : vector<8x6xf32>
    %17 = math.exp %16 : vector<8x6xf32>
    %cst_12 = arith.constant dense<0.000000e+00> : vector<8xf32>
    %18 = vector.multi_reduction <add>, %17, %cst_12 [1] : vector<8x6xf32> to vector<8xf32>
    %19 = vector.shape_cast %18 : vector<8xf32> to vector<8x1xf32>
    %20 = tpu.reciprocal %19 : vector<8x1xf32> -> vector<8x1xf32>
    %21 = vector.broadcast %20 : vector<8x1xf32> to vector<8x6xf32>
    %22 = arith.mulf %17, %21 : vector<8x6xf32>
    %c0_13 = arith.constant 0 : index
    %c0_14 = arith.constant 0 : index
    %23 = vector.load %arg6[%c0_13, %c0_14] : memref<8x6xf32, #tpu.memory_space<vmem>>, vector<8x6xf32>
    tpu.vector_store %arg6[%c0_13, %c0_14], %22 {strides = array<i32>} : memref<8x6xf32, #tpu.memory_space<vmem>>, vector<8x6xf32>,
    return
  }
  func.func @transform_0(%arg0: i32) -> (i32, i32) {
    %c0_i32 = arith.constant 0 : i32
    %c0_i32_0 = arith.constant 0 : i32
    return %arg0, %c0_i32 : i32, i32
  }
  func.func @transform_1(%arg0: i32) -> (i32, i32) {
    %c0_i32 = arith.constant 0 : i32
    %c0_i32_0 = arith.constant 0 : i32
    %c0_i32_1 = arith.constant 0 : i32
    return %c0_i32, %c0_i32_0 : i32, i32
  }
  func.func @transform_2(%arg0: i32) -> (i32, i32) {
    %c0_i32 = arith.constant 0 : i32
    %c0_i32_0 = arith.constant 0 : i32
    %c0_i32_1 = arith.constant 0 : i32
    return %c0_i32, %c0_i32_0 : i32, i32
  }
  func.func @transform_3(%arg0: i32) -> (i32, i32) {
    %c0_i32 = arith.constant 0 : i32
    %c0_i32_0 = arith.constant 0 : i32
    %c0_i32_1 = arith.constant 0 : i32
    return %c0_i32, %c0_i32_0 : i32, i32
  }
  func.func @transform_4(%arg0: i32) -> (i32, i32) {
    %c0_i32 = arith.constant 0 : i32
    %c0_i32_0 = arith.constant 0 : i32
    %c0_i32_1 = arith.constant 0 : i32
    return %c0_i32, %c0_i32_0 : i32, i32
  }
  func.func @transform_5(%arg0: i32) -> (i32, i32) {
    %c0_i32 = arith.constant 0 : i32
    %c0_i32_0 = arith.constant 0 : i32
    return %arg0, %c0_i32 : i32, i32
  }
}

</mosaic_0001>

<bundles_post_ra>
// kernel: tpu_custom_call.1
= control target key start
LH: loop header
LB: loop body
LE: loop exit
PB: predicated region body
PF: predicated region fallthrough
CT: control target
= control target key end

     0   :  { %v328_v1 = vmov 0.0   ;;  %vm329_vm0 = vmmov 0   ;;  %vm33_vm1 = vcmask 261120   ;;  %s460_s0 = inlined_call_operand.vmem [shape: f32[8,32], index: 0, kind: input, shape index: {}]   ;;  %s461_s1 = inlined_call_operand.vmem [shape: f32[32,128], index: 1, kind: input, shape index: {}]   ;;  %s462_s2 = inlined_call_operand.vmem [shape: f32[1,128], index: 2, kind: input, shape index: {}]   ;;  %s463_s3 = inlined_call_operand.vmem [shape: f32[128,6], index: 3, kind: input, shape index: {}]   ;;  %s464_s4 = inlined_call_operand.vmem [shape: f32[1,6], index: 4, kind: input, shape index: {}]   ;;  %s465_s5 = inlined_call_operand.hbm [shape: f32[8,6], index: 5, kind: output, shape index: {}]  }
   0x1   :  { %v25_v0 = vld [vmem:[%s461_s1 + $0x18] sm:$0xff]  ;;  %253 = vmatprep.subr.mxu0 %v328_v1  ;;  %v24_v2 = vld [vmem:[%s461_s1 + $0x10] sm:$0xff]  ;;  %261 = vmatprep.mubr.msk.f32.mxu0 %vm329_vm0, %v328_v1  ;;  %v23_v5 = vld [vmem:[%s461_s1 + $0x8] sm:$0xff] }
   0x2   :  { %v123_v3 = vld [vmem:[%s463_s3 + $0x78] sm:$0xff]  ;;  %254 = vmatpush3.msra.mxu0 %v25_v0  ;;  %264 = vmatprep.subr.mxu1 %v328_v1  ;;  %v122_v4 = vld [vmem:[%s463_s3 + $0x70] sm:$0xff]  ;;  %v121_v6 = vld [vmem:[%s463_s3 + $0x68] sm:$0xff] }
   0x3   :  { %255 = vmatprep.subr.mxu0 %v328_v1  ;;  %265 = vmatpush3.msra.mxu1 %v123_v3  ;;  %v22_v7 = vld [vmem:[%s461_s1] sm:$0xff] }
   0x4   :  { %256 = vmatpush3.msra.mxu0 %v24_v2  ;;  %266 = vmatprep.subr.mxu1 %v328_v1  ;;  %v21_v8 = vld [vmem:[%s460_s0] sm:$0xff] }
   0x5   :  { %257 = vmatprep.subr.mxu0 %v328_v1  ;;  %267 = vmatpush3.msra.mxu1 %v122_v4  ;;  %v120_v9 = vld [vmem:[%s463_s3 + $0x60] sm:$0xff] }
   0x6   :  { %258 = vmatpush3.msra.mxu0 %v23_v5  ;;  %268 = vmatprep.subr.mxu1 %v328_v1 }
   0x7   :  { %10 = vsyncpa [#allocation3], 0  ;;  %259 = vmatprep.subr.mxu0 %v328_v1  ;;  %269 = vmatpush3.msra.mxu1 %v121_v6  ;;  %v119_v10 = vld [vmem:[%s463_s3 + $0x58] sm:$0xff]  ;;  %v118_v11 = vld [vmem:[%s463_s3 + $0x50] sm:$0xff]  ;;  %vm201_vm2 = vcmask 48128  }
   0x8   :  { %260 = vmatpush3.msra.mxu0 %v22_v7  ;;  %270 = vmatprep.subr.mxu1 %v328_v1  ;;  %v117_v12 = vld [vmem:[%s463_s3 + $0x48] sm:$0xff]  ;;  %v116_v13 = vld [vmem:[%s463_s3 + $0x40] sm:$0xff]  ;;  %v115_v14 = vld [vmem:[%s463_s3 + $0x38] sm:$0xff] }
   0x9   :  { %262 = vmatmul.mubr.msk.f32.vlgmr.msra.gmra.mxu0 %vm33_vm1, %v21_v8  ;;  %271 = vmatpush3.msra.mxu1 %v120_v9  ;;  %v114_v15 = vld [vmem:[%s463_s3 + $0x30] sm:$0xff]  ;;  %v113_v16 = vld [vmem:[%s463_s3 + $0x28] sm:$0xff]  ;;  %v112_v17 = vld [vmem:[%s463_s3 + $0x20] sm:$0xff] }
   0xa   :  { %272 = vmatprep.subr.mxu1 %v328_v1  ;;  %296 = vmatprep.mubr.msk.f32.mxu1 %vm329_vm0, %v328_v1  ;;  %v111_v18 = vld [vmem:[%s463_s3 + $0x18] sm:$0xff]  ;;  %v110_v19 = vld [vmem:[%s463_s3 + $0x10] sm:$0xff]  ;;  %v109_v20 = vld [vmem:[%s463_s3 + $0x8] sm:$0xff] }
   0xb   :  { %273 = vmatpush3.msra.mxu1 %v119_v10  ;;  %v108_v21 = vld [vmem:[%s463_s3] sm:$0xff] }
   0xc   :  { %274 = vmatprep.subr.mxu1 %v328_v1  ;;  %v228_v22 = vld [vmem:[%s462_s2] ss:$0 sm:$0xff]  ;;  %s330_s2 = smov [#allocation2]  }
   0xd   :  { %275 = vmatpush3.msra.mxu1 %v118_v11  ;;  %v230_v27 = vld [vmem:[%s464_s4] ss:$0 sm:$0xff]  ;;  %s220_s3 = sshll.u32 %s330_s2, 4  ;;  %s221_s3 = int_to_ptr.vmem [resolvable:$true] %s220_s3 }
   0xe   :  { %276 = vmatprep.subr.mxu1 %v328_v1  ;;  %s306_s4 = scalar_lea.vmem %s221_s3, 128  ;;  %p311_p1 = scmp.lt.s32.totalorder %s221_s3, %s221_s3 }
   0xf   :  { %277 = vmatpush3.msra.mxu1 %v117_v12  ;;  %p307_p0 = scmp.ne.s32.totalorder %s221_s3, %s306_s4  ;;  %p312_p2 = scmp.lt.s32.totalorder %s306_s4, %s306_s4 }
  0x10   :  { %278 = vmatprep.subr.mxu1 %v328_v1 }
  0x11   :  { %279 = vmatpush3.msra.mxu1 %v116_v13  ;;  %p313_p3 = por %p312_p2, %p311_p1 }
  0x12   :  { %280 = vmatprep.subr.mxu1 %v328_v1 }
  0x13   :  { %281 = vmatpush3.msra.mxu1 %v115_v14  ;;  %p314_p4 = pnand %p313_p3, %p307_p0 }
  0x14   :  { %282 = vmatprep.subr.mxu1 %v328_v1 }
  0x15   :  { %283 = vmatpush3.msra.mxu1 %v114_v15 }
  0x16   :  { %284 = vmatprep.subr.mxu1 %v328_v1 }
  0x17   :  { %285 = vmatpush3.msra.mxu1 %v113_v16 }
  0x18   :  { %286 = vmatprep.subr.mxu1 %v328_v1 }
  0x19   :  { %287 = vmatpush3.msra.mxu1 %v112_v17 }
  0x1a   :  { %288 = vmatprep.subr.mxu1 %v328_v1 }
  0x1b   :  { %289 = vmatpush3.msra.mxu1 %v111_v18 }
  0x1c   :  { %290 = vmatprep.subr.mxu1 %v328_v1 }
  0x1d   :  { %291 = vmatpush3.msra.mxu1 %v110_v19 }
  0x1e   :  { %292 = vmatprep.subr.mxu1 %v328_v1 }
  0x1f   :  { %293 = vmatpush3.msra.mxu1 %v109_v20 }
  0x20   :  { %294 = vmatprep.subr.mxu1 %v328_v1 }
  0x21   :  { %295 = vmatpush3.msra.mxu1 %v108_v21 }
  0xc9   :  { %v103_v23 = vpop.f32.mrf.mxu0 }
  0xca   :  { %v104_v24 = vadd.f32 %v228_v22, %v103_v23 }
  0xcb   :  { %v263_v25 = vpop.f32.mrf.mxu0 }
  0xcc   :  { %v107_v26 = vmax.f32 %v104_v24, 0.0 }
  0xce   :  { %297 = vmatmul.mubr.f32.vlgmr.msra.gmra.mxu1 %v107_v26 }
 0x18e   :  { %v197_v28 = vpop.f32.mrf.mxu1 }
 0x18f   :  { %v198_v29 = vadd.f32 %v230_v27, %v197_v28 }
 0x190   :  { %v298_v30 = vpop.f32.mrf.mxu1 }
 0x191   :  { %v202_v31 = vsel %vm201_vm2, %v198_v29, -inf }
 0x192   :  { %203 = vmax.xlane.f32.xlu0 %v202_v31 }
 0x21b   :  { %v204_v32 = vpop.xlane.xlu0 %203 }
 0x21c   :  { %v205_v33 = vsub.f32 %v198_v29, %v204_v32 }
 0x21e   :  { %v206_v34 = vmul.f32 1.442695, %v205_v33 }
 0x220   :  { %302 = vpow2.f32 %v206_v34 }
 0x22d   :  { %v303_v35 = vpop.eup %302 }
 0x22e   :  { %v208_v36 = vsel %vm201_vm2, %v303_v35, 0.0 }
 0x22f   :  { %209 = vadd.xlane.f32.xlu0 %v208_v36 }
 0x2b8   :  { %v210_v37 = vpop.xlane.xlu0 %209 }
 0x2b9   :  { %304 = vrcp.f32 %v210_v37 }
 0x2c6   :  { %v305_v38 = vpop.eup %304 }
 0x2c7   :  { %v212_v39 = vmul.f32 %v305_v38, %v303_v35 }
 0x2c9   :  { %213 = vst.msk [vmem:[#allocation2] sm:$0xff] %vm201_vm2, %v212_v39 }
 0x2ca   :  { %317 = shalt.err (!%p314_p4)
}
 0x2cb   :  { %223 = dma.vmem_to_hbm [thread:$0]  %s221_s3, 128, %s465_s5, [#allocation3]  }
 0x2cc   :  { %326 = dma.done.wait [#allocation3], 128  }
 0x2cd   :  { %327 = vsyncadd [#allocation3], 4294967168 }
 0x2ce   :  { %227 = vsyncpa [#allocation3], 1 }

</bundles_post_ra>
